<compile_context>
chip_gen: v6e
topology: v6e:2x2x1
jax: 0.10.0
libtpu: 0.0.40
codegen_flags: <defaults>
</compile_context>

<pallas_src>
import functools

import jax
import jax.numpy as jnp
from jax import lax
from jax.experimental import pallas as pl
from jax.experimental.pallas import tpu as pltpu


def _acp_kernel(x_ref, o_ref, max_acc, sum_acc, *, L, TL, inv_L, mask_tail):
    """Process one (TM, TL) tile of the flattened (N*C, L) input.

    grid = (row_tiles, l_tiles); axis 1 (L) is the reduction axis.
      x_ref:   (TM, TL) input tile (native dtype)
      o_ref:   (TM, 2) output block for this row tile: col 0 = max, col 1 = mean
      max_acc: (TM, 1) VMEM running max (native dtype)
      sum_acc: (TM, 1) VMEM running sum (float32)
    """
    k = pl.program_id(1)

    @pl.when(k == 0)
    def _init():
        max_acc[...] = jnp.full(max_acc.shape, -jnp.inf, dtype=max_acc.dtype)
        sum_acc[...] = jnp.zeros(sum_acc.shape, dtype=sum_acc.dtype)

    x = x_ref[...]                                       # (TM, TL)
    if mask_tail:
        col = lax.broadcasted_iota(jnp.int32, x.shape, 1) + k * TL
        valid = col < L
        x_max = jnp.where(valid, x, jnp.asarray(-jnp.inf, dtype=x.dtype))
        x_sum = jnp.where(valid, x.astype(jnp.float32), jnp.float32(0.0))
    else:
        x_max = x
        x_sum = x.astype(jnp.float32)

    # Max stays in the native dtype (free on v6e/v7x); sum accumulates in f32.
    max_acc[...] = jnp.maximum(max_acc[...], jnp.max(x_max, axis=-1, keepdims=True))
    sum_acc[...] = sum_acc[...] + jnp.sum(x_sum, axis=-1, keepdims=True)

    @pl.when(k == pl.num_programs(1) - 1)
    def _finalize():
        mx = max_acc[...].astype(jnp.float32)            # (TM, 1)
        mean = sum_acc[...] * inv_L                      # (TM, 1), 1/L folded in once
        o_ref[...] = jnp.concatenate([mx, mean], axis=1).astype(o_ref.dtype)


def adaptive_concat_pool1d(x, *, tm_cap=512, tl_cap=1024):
    """x: (N, C, L) -> (N, 2*C, 1). Equivalent to
    torch.cat([AdaptiveMaxPool1d(1)(x), AdaptiveAvgPool1d(1)(x)], dim=1)."""
    assert tm_cap % 8 == 0, "tm_cap must be a multiple of 8"
    assert tl_cap % 128 == 0, "tl_cap must be a multiple of 128"

    N, C, L = x.shape
    R = N * C
    x2 = x.reshape(R, L)                                 # free (contiguous) reshape

    # Row tile: as many rows as possible per grid step (amortizes ~0.35us/step).
    TM = R if R <= tm_cap else tm_cap                    # full dim or multiple of 8
    # L tile: full L when it fits, else a multiple-of-128 chunk (mask the tail).
    TL = L if L <= tl_cap else tl_cap
    row_tiles = pl.cdiv(R, TM)
    l_tiles = pl.cdiv(L, TL)
    R_pad = row_tiles * TM
    mask_tail = (L % TL) != 0

    itemsize = x.dtype.itemsize
    kernel = functools.partial(
        _acp_kernel, L=L, TL=TL, inv_L=1.0 / L, mask_tail=mask_tail
    )

    out = pl.pallas_call(
        kernel,
        out_shape=jax.ShapeDtypeStruct((R_pad, 2), x.dtype),
        grid_spec=pltpu.PrefetchScalarGridSpec(
            num_scalar_prefetch=0,
            grid=(row_tiles, l_tiles),                   # reduction axis (L) last
            in_specs=[pl.BlockSpec((TM, TL), lambda i, k: (i, k))],
            out_specs=pl.BlockSpec((TM, 2), lambda i, k: (i, 0)),
            scratch_shapes=[
                pltpu.VMEM((TM, 1), x.dtype),            # running max
                pltpu.VMEM((TM, 1), jnp.float32),        # running sum
            ],
        ),
        compiler_params=pltpu.CompilerParams(
            dimension_semantics=("parallel", "arbitrary"),
        ),
        cost_estimate=pl.CostEstimate(
            flops=2 * R * L,
            transcendentals=0,
            bytes_accessed=R * L * itemsize + R_pad * 2 * itemsize,
        ),
    )(x2)

    # Tiny host-side reassembly: (R_pad, 2) -> (N, 2C, 1), max first (torch.cat order).
    mx = out[:R, 0].reshape(N, C, 1)
    avg = out[:R, 1].reshape(N, C, 1)
    return jnp.concatenate([mx, avg], axis=1)


if __name__ == "__main__":
    # Module's own example shape: torch.randn(16, 8, 100).
    N, C, L = 16, 8, 100
    key = jax.random.PRNGKey(0)
    x = jax.random.normal(key, (N, C, L), dtype=jnp.float32)

    out = jax.block_until_ready(adaptive_concat_pool1d(x))
    ref = jnp.concatenate(
        [jnp.max(x, axis=-1, keepdims=True), jnp.mean(x, axis=-1, keepdims=True)],
        axis=1,
    )
    assert out.shape == (N, 2 * C, 1), out.shape
    assert jnp.allclose(out, ref, atol=1e-5, rtol=1e-5), "mismatch vs reference"

    # Exercise the tiled path (multiple row tiles, multiple L tiles, masked tail)
    # at small scale by shrinking the tile caps.
    x2 = jax.random.normal(jax.random.PRNGKey(1), (4, 8, 300), dtype=jnp.float32)
    out2 = jax.block_until_ready(adaptive_concat_pool1d(x2, tm_cap=16, tl_cap=128))
    ref2 = jnp.concatenate(
        [jnp.max(x2, axis=-1, keepdims=True), jnp.mean(x2, axis=-1, keepdims=True)],
        axis=1,
    )
    assert out2.shape == (4, 16, 1), out2.shape
    assert jnp.allclose(out2, ref2, atol=1e-5, rtol=1e-5), "mismatch vs reference (tiled)"

    print("KERNEL_OK")
</pallas_src>

<mosaic_0001>
module attributes {stable_mosaic.version = 11 : i64} {
  func.func @_acp_kernel(%arg0: i32, %arg1: i32, %arg2: memref<128x100xf32, #tpu.memory_space<vmem>>, %arg3: memref<128x2xf32, #tpu.memory_space<vmem>>, %arg4: memref<128x1xf32, #tpu.memory_space<vmem>>, %arg5: memref<128x1xf32, #tpu.memory_space<vmem>>) attributes {dimension_semantics = [#tpu.dimension_semantics<parallel>, #tpu.dimension_semantics<arbitrary>], iteration_bounds = array<i64: 1, 1>, scalar_prefetch = 0 : i64, scratch_operands = 2 : i64, tpu.core_type = #tpu.core_type<tc>, window_params = [{transform_indices = @transform_0, window_bounds = array<i64: 128, 100>}, {transform_indices = @transform_1, window_bounds = array<i64: 128, 2>}]} {
    %c0_i32 = arith.constant 0 : i32
    %0 = arith.cmpi eq, %arg1, %c0_i32 : i32
    %1 = arith.extui %0 : i1 to i32
    %c0_i32_0 = arith.constant 0 : i32
    %2 = arith.cmpi ne, %1, %c0_i32_0 : i32
    scf.if %2 {
      %cst_13 = arith.constant 0xFF800000 : f32
      %17 = vector.broadcast %cst_13 : f32 to vector<128x1xf32>
      %c0_14 = arith.constant 0 : index
      %c0_15 = arith.constant 0 : index
      %18 = vector.load %arg4[%c0_14, %c0_15] : memref<128x1xf32, #tpu.memory_space<vmem>>, vector<128x1xf32>
      tpu.vector_store %arg4[%c0_14, %c0_15], %17 {strides = array<i32>} : memref<128x1xf32, #tpu.memory_space<vmem>>, vector<128x1xf32>,
      %cst_16 = arith.constant 0.000000e+00 : f32
      %19 = vector.broadcast %cst_16 : f32 to vector<128x1xf32>
      %c0_17 = arith.constant 0 : index
      %c0_18 = arith.constant 0 : index
      %20 = vector.load %arg5[%c0_17, %c0_18] : memref<128x1xf32, #tpu.memory_space<vmem>>, vector<128x1xf32>
      tpu.vector_store %arg5[%c0_17, %c0_18], %19 {strides = array<i32>} : memref<128x1xf32, #tpu.memory_space<vmem>>, vector<128x1xf32>,
    } else {
    }
    %c0 = arith.constant 0 : index
    %c0_1 = arith.constant 0 : index
    %3 = vector.load %arg2[%c0, %c0_1] : memref<128x100xf32, #tpu.memory_space<vmem>>, vector<128x100xf32>
    %c0_2 = arith.constant 0 : index
    %c0_3 = arith.constant 0 : index
    %4 = vector.load %arg4[%c0_2, %c0_3] : memref<128x1xf32, #tpu.memory_space<vmem>>, vector<128x1xf32>
    %cst = arith.constant dense<0xFF800000> : vector<128xf32>
    %5 = vector.multi_reduction <maximumf>, %3, %cst [1] : vector<128x100xf32> to vector<128xf32>
    %6 = vector.shape_cast %5 : vector<128xf32> to vector<128x1xf32>
    %7 = arith.maximumf %4, %6 : vector<128x1xf32>
    %c0_4 = arith.constant 0 : index
    %c0_5 = arith.constant 0 : index
    %8 = vector.load %arg4[%c0_4, %c0_5] : memref<128x1xf32, #tpu.memory_space<vmem>>, vector<128x1xf32>
    tpu.vector_store %arg4[%c0_4, %c0_5], %7 {strides = array<i32>} : memref<128x1xf32, #tpu.memory_space<vmem>>, vector<128x1xf32>,
    %c0_6 = arith.constant 0 : index
    %c0_7 = arith.constant 0 : index
    %9 = vector.load %arg5[%c0_6, %c0_7] : memref<128x1xf32, #tpu.memory_space<vmem>>, vector<128x1xf32>
    %cst_8 = arith.constant dense<0.000000e+00> : vector<128xf32>
    %10 = vector.multi_reduction <add>, %3, %cst_8 [1] : vector<128x100xf32> to vector<128xf32>
    %11 = vector.shape_cast %10 : vector<128xf32> to vector<128x1xf32>
    %12 = arith.addf %9, %11 : vector<128x1xf32>
    %c0_9 = arith.constant 0 : index
    %c0_10 = arith.constant 0 : index
    %13 = vector.load %arg5[%c0_9, %c0_10] : memref<128x1xf32, #tpu.memory_space<vmem>>, vector<128x1xf32>
    tpu.vector_store %arg5[%c0_9, %c0_10], %12 {strides = array<i32>} : memref<128x1xf32, #tpu.memory_space<vmem>>, vector<128x1xf32>,
    %c0_i32_11 = arith.constant 0 : i32
    %14 = arith.cmpi eq, %arg1, %c0_i32_11 : i32
    %15 = arith.extui %14 : i1 to i32
    %c0_i32_12 = arith.constant 0 : i32
    %16 = arith.cmpi ne, %15, %c0_i32_12 : i32
    scf.if %16 {
      %c0_13 = arith.constant 0 : index
      %c0_14 = arith.constant 0 : index
      %17 = vector.load %arg4[%c0_13, %c0_14] : memref<128x1xf32, #tpu.memory_space<vmem>>, vector<128x1xf32>
      %c0_15 = arith.constant 0 : index
      %c0_16 = arith.constant 0 : index
      %18 = vector.load %arg5[%c0_15, %c0_16] : memref<128x1xf32, #tpu.memory_space<vmem>>, vector<128x1xf32>
      %cst_17 = arith.constant 0.00999999977 : f32
      %19 = vector.broadcast %cst_17 : f32 to vector<128x1xf32>
      %20 = arith.mulf %18, %19 : vector<128x1xf32>
      %21 = tpu.concatenate %17, %20 in 1 : vector<128x1xf32>, vector<128x1xf32> -> vector<128x2xf32>
      %c0_18 = arith.constant 0 : index
      %c0_19 = arith.constant 0 : index
      %22 = vector.load %arg3[%c0_18, %c0_19] : memref<128x2xf32, #tpu.memory_space<vmem>>, vector<128x2xf32>
      tpu.vector_store %arg3[%c0_18, %c0_19], %21 {strides = array<i32>} : memref<128x2xf32, #tpu.memory_space<vmem>>, vector<128x2xf32>,
    } else {
    }
    return
  }
  func.func @transform_0(%arg0: i32, %arg1: i32) -> (i32, i32) {
    %c0_i32 = arith.constant 0 : i32
    return %arg0, %arg1 : i32, i32
  }
  func.func @transform_1(%arg0: i32, %arg1: i32) -> (i32, i32) {
    %c0_i32 = arith.constant 0 : i32
    %c0_i32_0 = arith.constant 0 : i32
    return %arg0, %c0_i32 : i32, i32
  }
}

</mosaic_0001>

<bundles_post_ra>
// kernel: tpu_custom_call.1
= control target key start
LH: loop header
LB: loop body
LE: loop exit
PB: predicated region body
PF: predicated region fallthrough
CT: control target
= control target key end

     0   :  { %vm77_vm0 = vcmask 818176   ;;  %vm12_vm1 = vcmask 7168   ;;  %v410_v3 = vmov 0.0   ;;  %v411_v49 = vmov -inf   ;;  %s675_s0 = inlined_call_operand.vmem [shape: f32[128,100], index: 0, kind: input, shape index: {}]   ;;  %s676_s1 = inlined_call_operand.vmem [shape: f32[128,2], index: 1, kind: output, shape index: {}]  }
   0x1   :  { %v426_v0 = vld [vmem:[%s675_s0] sm:$0xff]  ;;  %v431_v1 = vld [vmem:[%s675_s0 + $0x8] sm:$0xff]  ;;  %v436_v2 = vld [vmem:[%s675_s0 + $0x10] sm:$0xff]  ;;  %29 = vst.msk [vmem:[#allocation3] sm:$0xff] %vm12_vm1, %v410_v3  ;;  %vm386_vm2 = vcmask 15360  }
   0x2   :  { %30 = vst.msk [vmem:[#allocation3 + $0x8] sm:$0xff] %vm12_vm1, %v410_v3  ;;  %31 = vst.msk [vmem:[#allocation3 + $0x10] sm:$0xff] %vm12_vm1, %v410_v3  ;;  %v175_v4 = vsel %vm77_vm0, %v426_v0, 0.0  ;;  %v181_v5 = vsel %vm77_vm0, %v436_v2, 0.0  ;;  %v48_v6 = vld [vmem:[%s675_s0 + $0x18] sm:$0xff]  ;;  %v178_v7 = vsel %vm77_vm0, %v431_v1, 0.0 }
   0x3   :  { %32 = vst.msk [vmem:[#allocation3 + $0x18] sm:$0xff] %vm12_vm1, %v410_v3  ;;  %33 = vst.msk [vmem:[#allocation3 + $0x20] sm:$0xff] %vm12_vm1, %v410_v3  ;;  %176 = vadd.xlane.f32.xlu0 %v175_v4  ;;  %182 = vadd.xlane.f32.xlu1 %v181_v5  ;;  %v184_v8 = vsel %vm77_vm0, %v48_v6, 0.0  ;;  %v49_v9 = vld [vmem:[%s675_s0 + $0x20] sm:$0xff]  ;;  %v50_v10 = vld [vmem:[%s675_s0 + $0x28] sm:$0xff]  ;;  %v78_v33 = vsel %vm77_vm0, %v426_v0, -inf }
   0x4   :  { %34 = vst.msk [vmem:[#allocation3 + $0x28] sm:$0xff] %vm12_vm1, %v410_v3  ;;  %35 = vst.msk [vmem:[#allocation3 + $0x30] sm:$0xff] %vm12_vm1, %v410_v3  ;;  %v187_v11 = vsel %vm77_vm0, %v49_v9, 0.0  ;;  %v190_v12 = vsel %vm77_vm0, %v50_v10, 0.0  ;;  %v51_v13 = vld [vmem:[%s675_s0 + $0x30] sm:$0xff]  ;;  %v52_v14 = vld [vmem:[%s675_s0 + $0x38] sm:$0xff] }
   0x5   :  { %36 = vst.msk [vmem:[#allocation3 + $0x38] sm:$0xff] %vm12_vm1, %v410_v3  ;;  %37 = vst.msk [vmem:[#allocation3 + $0x40] sm:$0xff] %vm12_vm1, %v410_v3  ;;  %v193_v15 = vsel %vm77_vm0, %v51_v13, 0.0  ;;  %v196_v16 = vsel %vm77_vm0, %v52_v14, 0.0  ;;  %v53_v17 = vld [vmem:[%s675_s0 + $0x40] sm:$0xff]  ;;  %v54_v18 = vld [vmem:[%s675_s0 + $0x48] sm:$0xff] }
   0x6   :  { %38 = vst.msk [vmem:[#allocation3 + $0x48] sm:$0xff] %vm12_vm1, %v410_v3  ;;  %39 = vst.msk [vmem:[#allocation3 + $0x50] sm:$0xff] %vm12_vm1, %v410_v3  ;;  %v199_v19 = vsel %vm77_vm0, %v53_v17, 0.0  ;;  %v202_v20 = vsel %vm77_vm0, %v54_v18, 0.0  ;;  %v55_v21 = vld [vmem:[%s675_s0 + $0x50] sm:$0xff]  ;;  %v56_v22 = vld [vmem:[%s675_s0 + $0x58] sm:$0xff] }
   0x7   :  { %40 = vst.msk [vmem:[#allocation3 + $0x58] sm:$0xff] %vm12_vm1, %v410_v3  ;;  %41 = vst.msk [vmem:[#allocation3 + $0x60] sm:$0xff] %vm12_vm1, %v410_v3  ;;  %179 = vadd.xlane.f32.xlu0 %v178_v7  ;;  %185 = vadd.xlane.f32.xlu1 %v184_v8  ;;  %v205_v23 = vsel %vm77_vm0, %v55_v21, 0.0  ;;  %v208_v24 = vsel %vm77_vm0, %v56_v22, 0.0  ;;  %v57_v25 = vld [vmem:[%s675_s0 + $0x60] sm:$0xff]  ;;  %v58_v26 = vld [vmem:[%s675_s0 + $0x68] sm:$0xff] }
   0x8   :  { %42 = vst.msk [vmem:[#allocation3 + $0x68] sm:$0xff] %vm12_vm1, %v410_v3  ;;  %43 = vst.msk [vmem:[#allocation3 + $0x70] sm:$0xff] %vm12_vm1, %v410_v3  ;;  %v211_v27 = vsel %vm77_vm0, %v57_v25, 0.0  ;;  %v214_v28 = vsel %vm77_vm0, %v58_v26, 0.0  ;;  %v59_v29 = vld [vmem:[%s675_s0 + $0x70] sm:$0xff]  ;;  %v60_v30 = vld [vmem:[%s675_s0 + $0x78] sm:$0xff] }
   0x9   :  { %44 = vst.msk [vmem:[#allocation3 + $0x78] sm:$0xff] %vm12_vm1, %v410_v3  ;;  %v217_v31 = vsel %vm77_vm0, %v59_v29, 0.0  ;;  %v220_v32 = vsel %vm77_vm0, %v60_v30, 0.0  ;;  %v81_v34 = vsel %vm77_vm0, %v431_v1, -inf  ;;  %v84_v35 = vsel %vm77_vm0, %v436_v2, -inf  ;;  %13 = vst.msk [vmem:[#allocation2] sm:$0xff] %vm12_vm1, %v411_v49 }
   0xa   :  { %v87_v36 = vsel %vm77_vm0, %v48_v6, -inf  ;;  %v90_v37 = vsel %vm77_vm0, %v49_v9, -inf  ;;  %v93_v38 = vsel %vm77_vm0, %v50_v10, -inf  ;;  %v96_v39 = vsel %vm77_vm0, %v51_v13, -inf  ;;  %14 = vst.msk [vmem:[#allocation2 + $0x8] sm:$0xff] %vm12_vm1, %v411_v49  ;;  %15 = vst.msk [vmem:[#allocation2 + $0x10] sm:$0xff] %vm12_vm1, %v411_v49 }
   0xb   :  { %188 = vadd.xlane.f32.xlu0 %v187_v11  ;;  %191 = vadd.xlane.f32.xlu1 %v190_v12  ;;  %v99_v40 = vsel %vm77_vm0, %v52_v14, -inf  ;;  %v102_v41 = vsel %vm77_vm0, %v53_v17, -inf  ;;  %v105_v42 = vsel %vm77_vm0, %v54_v18, -inf  ;;  %v108_v43 = vsel %vm77_vm0, %v55_v21, -inf  ;;  %16 = vst.msk [vmem:[#allocation2 + $0x18] sm:$0xff] %vm12_vm1, %v411_v49  ;;  %17 = vst.msk [vmem:[#allocation2 + $0x20] sm:$0xff] %vm12_vm1, %v411_v49 }
   0xc   :  { %v111_v44 = vsel %vm77_vm0, %v56_v22, -inf  ;;  %v114_v45 = vsel %vm77_vm0, %v57_v25, -inf  ;;  %v117_v46 = vsel %vm77_vm0, %v58_v26, -inf  ;;  %v120_v47 = vsel %vm77_vm0, %v59_v29, -inf  ;;  %18 = vst.msk [vmem:[#allocation2 + $0x28] sm:$0xff] %vm12_vm1, %v411_v49  ;;  %19 = vst.msk [vmem:[#allocation2 + $0x30] sm:$0xff] %vm12_vm1, %v411_v49 }
   0xd   :  { %v123_v48 = vsel %vm77_vm0, %v60_v30, -inf  ;;  %20 = vst.msk [vmem:[#allocation2 + $0x38] sm:$0xff] %vm12_vm1, %v411_v49  ;;  %21 = vst.msk [vmem:[#allocation2 + $0x40] sm:$0xff] %vm12_vm1, %v411_v49  ;;  %v159_v50 = vld [vmem:[#allocation3] sm:$0xff]  ;;  %v161_v51 = vld [vmem:[#allocation3 + $0x10] sm:$0xff]  ;;  %s412_s0 = smov 1  }
   0xe   :  { %22 = vst.msk [vmem:[#allocation2 + $0x48] sm:$0xff] %vm12_vm1, %v411_v49  ;;  %23 = vst.msk [vmem:[#allocation2 + $0x50] sm:$0xff] %vm12_vm1, %v411_v49  ;;  %v160_v56 = vld [vmem:[#allocation3 + $0x8] sm:$0xff]  ;;  %v162_v57 = vld [vmem:[#allocation3 + $0x18] sm:$0xff] }
   0xf   :  { %194 = vadd.xlane.f32.xlu0 %v193_v15  ;;  %197 = vadd.xlane.f32.xlu1 %v196_v16  ;;  %24 = vst.msk [vmem:[#allocation2 + $0x58] sm:$0xff] %vm12_vm1, %v411_v49  ;;  %25 = vst.msk [vmem:[#allocation2 + $0x60] sm:$0xff] %vm12_vm1, %v411_v49  ;;  %v163_v62 = vld [vmem:[#allocation3 + $0x20] sm:$0xff]  ;;  %v164_v63 = vld [vmem:[#allocation3 + $0x28] sm:$0xff] }
  0x10   :  { %26 = vst.msk [vmem:[#allocation2 + $0x68] sm:$0xff] %vm12_vm1, %v411_v49  ;;  %27 = vst.msk [vmem:[#allocation2 + $0x70] sm:$0xff] %vm12_vm1, %v411_v49  ;;  %v165_v4 = vld [vmem:[#allocation3 + $0x30] sm:$0xff]  ;;  %v166_v6 = vld [vmem:[#allocation3 + $0x38] sm:$0xff] }
  0x11   :  { %28 = vst.msk [vmem:[#allocation2 + $0x78] sm:$0xff] %vm12_vm1, %v411_v49  ;;  %v167_v11 = vld [vmem:[#allocation3 + $0x40] sm:$0xff]  ;;  %v168_v15 = vld [vmem:[#allocation3 + $0x48] sm:$0xff]  ;;  %v170_v25 = vld [vmem:[#allocation3 + $0x58] sm:$0xff] }
  0x12   :  { %v171_v30 = vld [vmem:[#allocation3 + $0x60] sm:$0xff] }
  0x13   :  { %200 = vadd.xlane.f32.xlu0 %v199_v19  ;;  %203 = vadd.xlane.f32.xlu1 %v202_v20  ;;  %v169_v20 = vld [vmem:[#allocation3 + $0x50] sm:$0xff] }
  0x17   :  { %206 = vadd.xlane.f32.xlu0 %v205_v23  ;;  %209 = vadd.xlane.f32.xlu1 %v208_v24 }
  0x1b   :  { %212 = vadd.xlane.f32.xlu0 %v211_v27  ;;  %215 = vadd.xlane.f32.xlu1 %v214_v28 }
  0x1f   :  { %218 = vadd.xlane.f32.xlu0 %v217_v31  ;;  %221 = vadd.xlane.f32.xlu1 %v220_v32 }
  0x23   :  { %79 = vmax.xlane.f32.xlu0 %v78_v33  ;;  %82 = vmax.xlane.f32.xlu1 %v81_v34 }
  0x27   :  { %85 = vmax.xlane.f32.xlu0 %v84_v35  ;;  %88 = vmax.xlane.f32.xlu1 %v87_v36  ;;  %v172_v35 = vld [vmem:[#allocation3 + $0x68] sm:$0xff] }
  0x2b   :  { %91 = vmax.xlane.f32.xlu0 %v90_v37  ;;  %94 = vmax.xlane.f32.xlu1 %v93_v38 }
  0x2f   :  { %97 = vmax.xlane.f32.xlu0 %v96_v39  ;;  %100 = vmax.xlane.f32.xlu1 %v99_v40  ;;  %v173_v40 = vld [vmem:[#allocation3 + $0x70] sm:$0xff] }
  0x33   :  { %103 = vmax.xlane.f32.xlu0 %v102_v41  ;;  %106 = vmax.xlane.f32.xlu1 %v105_v42 }
  0x37   :  { %109 = vmax.xlane.f32.xlu0 %v108_v43  ;;  %112 = vmax.xlane.f32.xlu1 %v111_v44 }
  0x3b   :  { %115 = vmax.xlane.f32.xlu0 %v114_v45  ;;  %118 = vmax.xlane.f32.xlu1 %v117_v46  ;;  %v174_v45 = vld [vmem:[#allocation3 + $0x78] sm:$0xff] }
  0x3f   :  { %121 = vmax.xlane.f32.xlu0 %v120_v47  ;;  %124 = vmax.xlane.f32.xlu1 %v123_v48 }
  0x8c   :  { %v177_v52 = vpop.xlane.xlu0 %176  ;;  %v183_v53 = vpop.xlane.xlu1 %182 }
  0x8d   :  { %v223_v54 = vadd.f32 %v177_v52, %v159_v50  ;;  %v225_v55 = vadd.f32 %v183_v53, %v161_v51  ;;  %v61_v52 = vld [vmem:[#allocation2] sm:$0xff] }
  0x8f   :  { %239 = vst.msk [vmem:[#allocation3] sm:$0xff] %vm12_vm1, %v223_v54  ;;  %241 = vst.msk [vmem:[#allocation3 + $0x10] sm:$0xff] %vm12_vm1, %v225_v55  ;;  %v62_v55 = vld [vmem:[#allocation2 + $0x8] sm:$0xff] }
  0x90   :  { %v180_v58 = vpop.xlane.xlu0 %179  ;;  %v186_v59 = vpop.xlane.xlu1 %185 }
  0x91   :  { %v224_v60 = vadd.f32 %v180_v58, %v160_v56  ;;  %v226_v61 = vadd.f32 %v186_v59, %v162_v57 }
  0x93   :  { %240 = vst.msk [vmem:[#allocation3 + $0x8] sm:$0xff] %vm12_vm1, %v224_v60  ;;  %242 = vst.msk [vmem:[#allocation3 + $0x18] sm:$0xff] %vm12_vm1, %v226_v61 }
  0x94   :  { %v189_v0 = vpop.xlane.xlu0 %188  ;;  %v192_v1 = vpop.xlane.xlu1 %191 }
  0x95   :  { %v227_v2 = vadd.f32 %v189_v0, %v163_v62  ;;  %v228_v3 = vadd.f32 %v192_v1, %v164_v63  ;;  %v63_v62 = vld [vmem:[#allocation2 + $0x10] sm:$0xff]  ;;  %v64_v1 = vld [vmem:[#allocation2 + $0x18] sm:$0xff] }
  0x96   :  { %v274_v5 = vld [vmem:[#allocation3] sm:$0xff]  ;;  %v276_v14 = vld [vmem:[#allocation3 + $0x10] sm:$0xff] }
  0x97   :  { %243 = vst.msk [vmem:[#allocation3 + $0x20] sm:$0xff] %vm12_vm1, %v227_v2  ;;  %v290_v7 = vmul.f32 0.01, %v274_v5  ;;  %244 = vst.msk [vmem:[#allocation3 + $0x28] sm:$0xff] %vm12_vm1, %v228_v3  ;;  %v292_v21 = vmul.f32 0.01, %v276_v14 }
  0x98   :  { %v195_v8 = vpop.xlane.xlu0 %194  ;;  %v198_v9 = vpop.xlane.xlu1 %197 }
  0x99   :  { %v229_v10 = vadd.f32 %v195_v8, %v165_v4  ;;  %322 = vrot.lane.b32.xlu0 %v290_v7, %s412_s0  ;;  %v230_v12 = vadd.f32 %v198_v9, %v166_v6  ;;  %v65_v8 = vld [vmem:[#allocation2 + $0x20] sm:$0xff] }
  0x9a   :  { %v275_v13 = vld [vmem:[#allocation3 + $0x8] sm:$0xff]  ;;  %v277_v24 = vld [vmem:[#allocation3 + $0x18] sm:$0xff] }
  0x9b   :  { %245 = vst.msk [vmem:[#allocation3 + $0x30] sm:$0xff] %vm12_vm1, %v229_v10  ;;  %v291_v16 = vmul.f32 0.01, %v275_v13  ;;  %246 = vst.msk [vmem:[#allocation3 + $0x38] sm:$0xff] %vm12_vm1, %v230_v12  ;;  %v293_v31 = vmul.f32 0.01, %v277_v24 }
  0x9c   :  { %v201_v17 = vpop.xlane.xlu0 %200  ;;  %v204_v18 = vpop.xlane.xlu1 %203 }
  0x9d   :  { %v231_v19 = vadd.f32 %v201_v17, %v167_v11  ;;  %324 = vrot.lane.b32.xlu1 %v291_v16, %s412_s0  ;;  %v232_v22 = vadd.f32 %v204_v18, %v168_v15  ;;  %v66_v11 = vld [vmem:[#allocation2 + $0x28] sm:$0xff] }
  0x9e   :  { %v278_v23 = vld [vmem:[#allocation3 + $0x20] sm:$0xff]  ;;  %v279_v34 = vld [vmem:[#allocation3 + $0x28] sm:$0xff] }
  0x9f   :  { %247 = vst.msk [vmem:[#allocation3 + $0x40] sm:$0xff] %vm12_vm1, %v231_v19  ;;  %v294_v26 = vmul.f32 0.01, %v278_v23  ;;  %248 = vst.msk [vmem:[#allocation3 + $0x48] sm:$0xff] %vm12_vm1, %v232_v22  ;;  %v295_v41 = vmul.f32 0.01, %v279_v34 }
  0xa0   :  { %v207_v27 = vpop.xlane.xlu0 %206  ;;  %v210_v28 = vpop.xlane.xlu1 %209  ;;  %v67_v19 = vld [vmem:[#allocation2 + $0x30] sm:$0xff] }
  0xa1   :  { %v233_v29 = vadd.f32 %v207_v27, %v169_v20  ;;  %326 = vrot.lane.b32.xlu1 %v292_v21, %s412_s0  ;;  %330 = vrot.lane.b32.xlu0 %v294_v26, %s412_s0  ;;  %v234_v32 = vadd.f32 %v210_v28, %v170_v25  ;;  %v68_v20 = vld [vmem:[#allocation2 + $0x38] sm:$0xff]  ;;  %v69_v26 = vld [vmem:[#allocation2 + $0x40] sm:$0xff]  ;;  %v70_v27 = vld [vmem:[#allocation2 + $0x48] sm:$0xff] }
  0xa2   :  { %v280_v33 = vld [vmem:[#allocation3 + $0x30] sm:$0xff]  ;;  %v281_v44 = vld [vmem:[#allocation3 + $0x38] sm:$0xff] }
  0xa3   :  { %249 = vst.msk [vmem:[#allocation3 + $0x50] sm:$0xff] %vm12_vm1, %v233_v29  ;;  %v296_v36 = vmul.f32 0.01, %v280_v33  ;;  %250 = vst.msk [vmem:[#allocation3 + $0x58] sm:$0xff] %vm12_vm1, %v234_v32  ;;  %v297_v50 = vmul.f32 0.01, %v281_v44 }
  0xa4   :  { %v213_v37 = vpop.xlane.xlu0 %212  ;;  %v216_v38 = vpop.xlane.xlu1 %215  ;;  %v71_v32 = vld [vmem:[#allocation2 + $0x50] sm:$0xff]  ;;  %v72_v33 = vld [vmem:[#allocation2 + $0x58] sm:$0xff] }
  0xa5   :  { %v235_v39 = vadd.f32 %v213_v37, %v171_v30  ;;  %328 = vrot.lane.b32.xlu1 %v293_v31, %s412_s0  ;;  %334 = vrot.lane.b32.xlu0 %v296_v36, %s412_s0  ;;  %v236_v42 = vadd.f32 %v216_v38, %v172_v35  ;;  %v73_v38 = vld [vmem:[#allocation2 + $0x60] sm:$0xff]  ;;  %v75_v44 = vld [vmem:[#allocation2 + $0x70] sm:$0xff] }
  0xa6   :  { %v282_v43 = vld [vmem:[#allocation3 + $0x40] sm:$0xff]  ;;  %v283_v54 = vld [vmem:[#allocation3 + $0x48] sm:$0xff] }
  0xa7   :  { %251 = vst.msk [vmem:[#allocation3 + $0x60] sm:$0xff] %vm12_vm1, %v235_v39  ;;  %v298_v46 = vmul.f32 0.01, %v282_v43  ;;  %252 = vst.msk [vmem:[#allocation3 + $0x68] sm:$0xff] %vm12_vm1, %v236_v42  ;;  %v299_v59 = vmul.f32 0.01, %v283_v54 }
  0xa8   :  { %v219_v47 = vpop.xlane.xlu0 %218  ;;  %v222_v48 = vpop.xlane.xlu1 %221  ;;  %v74_v39 = vld [vmem:[#allocation2 + $0x68] sm:$0xff] }
  0xa9   :  { %v237_v49 = vadd.f32 %v219_v47, %v173_v40  ;;  %332 = vrot.lane.b32.xlu1 %v295_v41, %s412_s0  ;;  %338 = vrot.lane.b32.xlu0 %v298_v46, %s412_s0  ;;  %v238_v51 = vadd.f32 %v222_v48, %v174_v45  ;;  %v76_v45 = vld [vmem:[#allocation2 + $0x78] sm:$0xff] }
  0xaa   :  { %v284_v53 = vld [vmem:[#allocation3 + $0x50] sm:$0xff]  ;;  %v285_v0 = vld [vmem:[#allocation3 + $0x58] sm:$0xff] }
  0xab   :  { %253 = vst.msk [vmem:[#allocation3 + $0x70] sm:$0xff] %vm12_vm1, %v237_v49  ;;  %v300_v56 = vmul.f32 0.01, %v284_v53  ;;  %254 = vst.msk [vmem:[#allocation3 + $0x78] sm:$0xff] %vm12_vm1, %v238_v51  ;;  %v301_v5 = vmul.f32 0.01, %v285_v0 }
  0xac   :  { %v80_v57 = vpop.xlane.xlu0 %79  ;;  %v83_v58 = vpop.xlane.xlu1 %82 }
  0xad   :  { %336 = vrot.lane.b32.xlu1 %v297_v50, %s412_s0  ;;  %342 = vrot.lane.b32.xlu0 %v300_v56, %s412_s0  ;;  %v126_v60 = vmax.f32 %v61_v52, %v80_v57  ;;  %v127_v61 = vmax.f32 %v62_v55, %v83_v58 }
  0xae   :  { %v286_v63 = vld [vmem:[#allocation3 + $0x60] sm:$0xff]  ;;  %v287_v10 = vld [vmem:[#allocation3 + $0x68] sm:$0xff] }
  0xaf   :  { %v302_v2 = vmul.f32 0.01, %v286_v63  ;;  %143 = vst.msk [vmem:[#allocation2] sm:$0xff] %vm12_vm1, %v126_v60  ;;  %144 = vst.msk [vmem:[#allocation2 + $0x8] sm:$0xff] %vm12_vm1, %v127_v61  ;;  %v303_v15 = vmul.f32 0.01, %v287_v10 }
  0xb0   :  { %v86_v3 = vpop.xlane.xlu0 %85  ;;  %v89_v4 = vpop.xlane.xlu1 %88 }
  0xb1   :  { %340 = vrot.lane.b32.xlu1 %v299_v59, %s412_s0  ;;  %346 = vrot.lane.b32.xlu0 %v302_v2, %s412_s0  ;;  %v128_v6 = vmax.f32 %v63_v62, %v86_v3  ;;  %v129_v7 = vmax.f32 %v64_v1, %v89_v4 }
  0xb2   :  { %v288_v9 = vld [vmem:[#allocation3 + $0x70] sm:$0xff]  ;;  %v289_v18 = vld [vmem:[#allocation3 + $0x78] sm:$0xff] }
  0xb3   :  { %v304_v12 = vmul.f32 0.01, %v288_v9  ;;  %145 = vst.msk [vmem:[#allocation2 + $0x10] sm:$0xff] %vm12_vm1, %v128_v6  ;;  %146 = vst.msk [vmem:[#allocation2 + $0x18] sm:$0xff] %vm12_vm1, %v129_v7  ;;  %v305_v23 = vmul.f32 0.01, %v289_v18 }
  0xb4   :  { %v92_v13 = vpop.xlane.xlu0 %91  ;;  %v95_v14 = vpop.xlane.xlu1 %94 }
  0xb5   :  { %344 = vrot.lane.b32.xlu1 %v301_v5, %s412_s0  ;;  %350 = vrot.lane.b32.xlu0 %v304_v12, %s412_s0  ;;  %v130_v16 = vmax.f32 %v65_v8, %v92_v13  ;;  %v131_v17 = vmax.f32 %v66_v11, %v95_v14 }
  0xb6   :  { %v258_v50 = vld [vmem:[#allocation2] sm:$0xff]  ;;  %v259_v53 = vld [vmem:[#allocation2 + $0x8] sm:$0xff] }
  0xb7   :  { %147 = vst.msk [vmem:[#allocation2 + $0x20] sm:$0xff] %vm12_vm1, %v130_v16  ;;  %148 = vst.msk [vmem:[#allocation2 + $0x28] sm:$0xff] %vm12_vm1, %v131_v17 }
  0xb8   :  { %v98_v21 = vpop.xlane.xlu0 %97  ;;  %v101_v22 = vpop.xlane.xlu1 %100 }
  0xb9   :  { %348 = vrot.lane.b32.xlu1 %v303_v15, %s412_s0  ;;  %v132_v24 = vmax.f32 %v67_v19, %v98_v21  ;;  %v133_v25 = vmax.f32 %v68_v20, %v101_v22 }
  0xba   :  { %v260_v57 = vld [vmem:[#allocation2 + $0x10] sm:$0xff]  ;;  %v261_v62 = vld [vmem:[#allocation2 + $0x18] sm:$0xff] }
  0xbb   :  { %149 = vst.msk [vmem:[#allocation2 + $0x30] sm:$0xff] %vm12_vm1, %v132_v24  ;;  %150 = vst.msk [vmem:[#allocation2 + $0x38] sm:$0xff] %vm12_vm1, %v133_v25 }
  0xbc   :  { %v104_v28 = vpop.xlane.xlu0 %103  ;;  %v107_v29 = vpop.xlane.xlu1 %106 }
  0xbd   :  { %352 = vrot.lane.b32.xlu1 %v305_v23, %s412_s0  ;;  %v134_v30 = vmax.f32 %v69_v26, %v104_v28  ;;  %v135_v31 = vmax.f32 %v70_v27, %v107_v29 }
  0xbe   :  { %v262_v58 = vld [vmem:[#allocation2 + $0x20] sm:$0xff]  ;;  %v263_v4 = vld [vmem:[#allocation2 + $0x28] sm:$0xff] }
  0xbf   :  { %151 = vst.msk [vmem:[#allocation2 + $0x40] sm:$0xff] %vm12_vm1, %v134_v30  ;;  %152 = vst.msk [vmem:[#allocation2 + $0x48] sm:$0xff] %vm12_vm1, %v135_v31 }
  0xc0   :  { %v110_v34 = vpop.xlane.xlu0 %109  ;;  %v113_v35 = vpop.xlane.xlu1 %112 }
  0xc1   :  { %v136_v36 = vmax.f32 %v71_v32, %v110_v34  ;;  %v137_v37 = vmax.f32 %v72_v33, %v113_v35 }
  0xc2   :  { %v264_v0 = vld [vmem:[#allocation2 + $0x30] sm:$0xff]  ;;  %v265_v10 = vld [vmem:[#allocation2 + $0x38] sm:$0xff] }
  0xc3   :  { %153 = vst.msk [vmem:[#allocation2 + $0x50] sm:$0xff] %vm12_vm1, %v136_v36  ;;  %154 = vst.msk [vmem:[#allocation2 + $0x58] sm:$0xff] %vm12_vm1, %v137_v37 }
  0xc4   :  { %v116_v40 = vpop.xlane.xlu0 %115  ;;  %v119_v41 = vpop.xlane.xlu1 %118 }
  0xc5   :  { %v138_v42 = vmax.f32 %v73_v38, %v116_v40  ;;  %v139_v43 = vmax.f32 %v74_v39, %v119_v41 }
  0xc6   :  { %v266_v6 = vld [vmem:[#allocation2 + $0x40] sm:$0xff]  ;;  %v267_v16 = vld [vmem:[#allocation2 + $0x48] sm:$0xff] }
  0xc7   :  { %155 = vst.msk [vmem:[#allocation2 + $0x60] sm:$0xff] %vm12_vm1, %v138_v42  ;;  %156 = vst.msk [vmem:[#allocation2 + $0x68] sm:$0xff] %vm12_vm1, %v139_v43 }
  0xc8   :  { %v122_v46 = vpop.xlane.xlu0 %121  ;;  %v125_v47 = vpop.xlane.xlu1 %124 }
  0xc9   :  { %v140_v48 = vmax.f32 %v75_v44, %v122_v46  ;;  %v141_v49 = vmax.f32 %v76_v45, %v125_v47 }
  0xca   :  { %v268_v12 = vld [vmem:[#allocation2 + $0x50] sm:$0xff]  ;;  %v269_v22 = vld [vmem:[#allocation2 + $0x58] sm:$0xff] }
  0xcb   :  { %157 = vst.msk [vmem:[#allocation2 + $0x70] sm:$0xff] %vm12_vm1, %v140_v48  ;;  %158 = vst.msk [vmem:[#allocation2 + $0x78] sm:$0xff] %vm12_vm1, %v141_v49 }
  0xce   :  { %v270_v18 = vld [vmem:[#allocation2 + $0x60] sm:$0xff]  ;;  %v271_v28 = vld [vmem:[#allocation2 + $0x68] sm:$0xff] }
  0xd2   :  { %v272_v24 = vld [vmem:[#allocation2 + $0x70] sm:$0xff]  ;;  %v273_v31 = vld [vmem:[#allocation2 + $0x78] sm:$0xff] }
 0x10b   :  { %v323_v51 = vpop.permute.xlu0 %322 }
 0x10c   :  { %v370_v52 = vsel %vm12_vm1, %v258_v50, %v323_v51 }
 0x10d   :  { %387 = vst.msk [vmem:[%s676_s1] sm:$0xff] %vm386_vm2, %v370_v52 }
 0x10f   :  { %v325_v54 = vpop.permute.xlu1 %324 }
 0x110   :  { %v371_v55 = vsel %vm12_vm1, %v259_v53, %v325_v54 }
 0x111   :  { %388 = vst.msk [vmem:[%s676_s1 + $0x8] sm:$0xff] %vm386_vm2, %v371_v55 }
 0x113   :  { %v327_v56 = vpop.permute.xlu1 %326  ;;  %v331_v59 = vpop.permute.xlu0 %330 }
 0x114   :  { %v372_v60 = vsel %vm12_vm1, %v260_v57, %v327_v56  ;;  %v374_v61 = vsel %vm12_vm1, %v262_v58, %v331_v59 }
 0x115   :  { %389 = vst.msk [vmem:[%s676_s1 + $0x10] sm:$0xff] %vm386_vm2, %v372_v60  ;;  %391 = vst.msk [vmem:[%s676_s1 + $0x20] sm:$0xff] %vm386_vm2, %v374_v61 }
 0x117   :  { %v329_v63 = vpop.permute.xlu1 %328  ;;  %v335_v1 = vpop.permute.xlu0 %334 }
 0x118   :  { %v373_v2 = vsel %vm12_vm1, %v261_v62, %v329_v63  ;;  %v376_v3 = vsel %vm12_vm1, %v264_v0, %v335_v1 }
 0x119   :  { %390 = vst.msk [vmem:[%s676_s1 + $0x18] sm:$0xff] %vm386_vm2, %v373_v2  ;;  %393 = vst.msk [vmem:[%s676_s1 + $0x30] sm:$0xff] %vm386_vm2, %v376_v3 }
 0x11b   :  { %v333_v5 = vpop.permute.xlu1 %332  ;;  %v339_v7 = vpop.permute.xlu0 %338 }
 0x11c   :  { %v375_v8 = vsel %vm12_vm1, %v263_v4, %v333_v5  ;;  %v378_v9 = vsel %vm12_vm1, %v266_v6, %v339_v7 }
 0x11d   :  { %392 = vst.msk [vmem:[%s676_s1 + $0x28] sm:$0xff] %vm386_vm2, %v375_v8  ;;  %395 = vst.msk [vmem:[%s676_s1 + $0x40] sm:$0xff] %vm386_vm2, %v378_v9 }
 0x11f   :  { %v337_v11 = vpop.permute.xlu1 %336  ;;  %v343_v13 = vpop.permute.xlu0 %342 }
 0x120   :  { %v377_v14 = vsel %vm12_vm1, %v265_v10, %v337_v11  ;;  %v380_v15 = vsel %vm12_vm1, %v268_v12, %v343_v13 }
 0x121   :  { %394 = vst.msk [vmem:[%s676_s1 + $0x38] sm:$0xff] %vm386_vm2, %v377_v14  ;;  %397 = vst.msk [vmem:[%s676_s1 + $0x50] sm:$0xff] %vm386_vm2, %v380_v15 }
 0x123   :  { %v341_v17 = vpop.permute.xlu1 %340  ;;  %v347_v19 = vpop.permute.xlu0 %346 }
 0x124   :  { %v379_v20 = vsel %vm12_vm1, %v267_v16, %v341_v17  ;;  %v382_v21 = vsel %vm12_vm1, %v270_v18, %v347_v19 }
 0x125   :  { %396 = vst.msk [vmem:[%s676_s1 + $0x48] sm:$0xff] %vm386_vm2, %v379_v20  ;;  %399 = vst.msk [vmem:[%s676_s1 + $0x60] sm:$0xff] %vm386_vm2, %v382_v21 }
 0x127   :  { %v345_v23 = vpop.permute.xlu1 %344  ;;  %v351_v25 = vpop.permute.xlu0 %350 }
 0x128   :  { %v381_v26 = vsel %vm12_vm1, %v269_v22, %v345_v23  ;;  %v384_v27 = vsel %vm12_vm1, %v272_v24, %v351_v25 }
 0x129   :  { %398 = vst.msk [vmem:[%s676_s1 + $0x58] sm:$0xff] %vm386_vm2, %v381_v26  ;;  %401 = vst.msk [vmem:[%s676_s1 + $0x70] sm:$0xff] %vm386_vm2, %v384_v27 }
 0x12b   :  { %v349_v29 = vpop.permute.xlu1 %348 }
 0x12c   :  { %v383_v30 = vsel %vm12_vm1, %v271_v28, %v349_v29 }
 0x12d   :  { %400 = vst.msk [vmem:[%s676_s1 + $0x68] sm:$0xff] %vm386_vm2, %v383_v30 }
 0x12f   :  { %v353_v32 = vpop.permute.xlu1 %352 }
 0x130   :  { %v385_v33 = vsel %vm12_vm1, %v273_v31, %v353_v32 }
 0x131   :  { %402 = vst.msk [vmem:[%s676_s1 + $0x78] sm:$0xff] %vm386_vm2, %v385_v33 }

</bundles_post_ra>
